<compile_context>
chip_gen: v5e
topology: v5e:2x2
jax: 0.10.0
libtpu: 0.0.40
codegen_flags: <defaults>
</compile_context>

<pallas_src>
import functools

import jax
import jax.numpy as jnp
from jax.experimental import pallas as pl
from jax.experimental.pallas import tpu as pltpu


def _round_up(x, m):
    return (x + m - 1) // m * m


def _vmem_cap_bytes():
    """Generation-aware VMEM budget (leave headroom under physical capacity)."""
    try:
        info = pltpu.get_tpu_info()
        cap = getattr(info, "vmem_capacity_bytes", None)
        if cap:
            return int(cap) * 3 // 4  # ~48 MiB on v7x, ~96 MiB on v5e/v6e
    except Exception:
        pass
    return 48 << 20  # v7x-safe fallback


def mlp_kernel(x_ref, w1_ref, b1_ref, w2_ref, b2_ref, o_ref, *, compute_dtype):
    # Hidden layer: (TB, In) @ (In, H) + (1, H).  MXU inputs in compute_dtype
    # (f32 or bf16); accumulation and sigmoid math stay f32 (v5e has no bf16
    # VPU/EUP).  Weights arrive pre-cast, so no per-step weight conversion.
    x = x_ref[...].astype(compute_dtype)
    h = jnp.dot(x, w1_ref[...], preferred_element_type=jnp.float32)
    h = h + b1_ref[...]
    # EUP-friendly sigmoid: exp + reciprocal (exp uses the otherwise-idle EUP
    # slot); approx=False keeps full f32 precision vs. the PyTorch reference.
    h = pl.reciprocal(1.0 + jnp.exp(-h), approx=False)

    # Output layer: (TB, H) @ (H, Out) + (1, Out); hidden never leaves vregs/VMEM.
    y = jnp.dot(h.astype(compute_dtype), w2_ref[...],
                preferred_element_type=jnp.float32)
    y = y + b2_ref[...]
    y = pl.reciprocal(1.0 + jnp.exp(-y), approx=False)

    o_ref[...] = y.astype(o_ref.dtype)


@functools.partial(jax.jit, static_argnames=("block_b", "compute_dtype"))
def mlp_forward(x, w1, b1, w2, b2, *, block_b=1024, compute_dtype=jnp.float32):
    """y = sigmoid(sigmoid(x @ w1 + b1) @ w2 + b2).

    x:  (B, In)   f32
    w1: (In, H)   f32 (pre-transposed vs. torch.nn.Linear.weight)
    b1: (1, H) or (H,)
    w2: (H, Out)  f32
    b2: (1, Out) or (Out,)
    """
    B, In = x.shape
    H = w1.shape[1]
    Out = w2.shape[1]
    SUBLANE = 8

    # Pre-cast grid-invariant weights once (halves DMA/residency for bf16);
    # biases stay f32 since they are added to the f32 accumulator.
    w1c = w1.astype(compute_dtype)
    w2c = w2.astype(compute_dtype)
    b1r = jnp.reshape(b1, (1, H)).astype(jnp.float32)
    b2r = jnp.reshape(b2, (1, Out)).astype(jnp.float32)

    # Adaptive batch tile: balance tiles to minimize ragged waste, amortize
    # per-step overhead, and keep >= 2 steps for big batches (v7x 2-TC sharding).
    n_tiles = pl.cdiv(B, block_b)
    if B >= 512:
        n_tiles = max(n_tiles, 2)
    TB = _round_up(pl.cdiv(B, n_tiles), SUBLANE)
    if TB >= B:
        TB = B  # single full-extent block (always a legal block dim)
    grid = (pl.cdiv(B, TB),)
    # No batch pad / output slice: the ragged last block is handled by Pallas
    # (OOB reads feed only rows whose OOB stores are dropped).

    itemsize = jnp.dtype(compute_dtype).itemsize
    resident_bytes = itemsize * (In * H + H * Out) + 4 * (H + Out)
    tile_bytes = 2 * 4 * TB * (In + Out)  # double-buffered x / out tiles
    vmem_limit = int(min(max(2 * (resident_bytes + tile_bytes), 16 << 20),
                         _vmem_cap_bytes()))
    # TODO(synk): if resident_bytes ever exceeds the per-generation VMEM budget
    # (large In/H on v7x's 64 MiB), fall back to a K/H-tiled variant with an
    # "arbitrary" reduction axis and a pl.when-gated accumulator.

    cost = pl.CostEstimate(
        flops=2 * B * (In * H + H * Out),
        transcendentals=B * (H + Out),
        bytes_accessed=int(4 * B * In + resident_bytes + 4 * B * Out),
    )

    return pl.pallas_call(
        functools.partial(mlp_kernel, compute_dtype=compute_dtype),
        out_shape=jax.ShapeDtypeStruct((B, Out), jnp.float32),
        grid=grid,
        in_specs=[
            pl.BlockSpec((TB, In), lambda i: (i, 0)),   # x streams over batch
            pl.BlockSpec((In, H), lambda i: (0, 0)),    # weights VMEM-resident
            pl.BlockSpec((1, H), lambda i: (0, 0)),
            pl.BlockSpec((H, Out), lambda i: (0, 0)),
            pl.BlockSpec((1, Out), lambda i: (0, 0)),
        ],
        out_specs=pl.BlockSpec((TB, Out), lambda i: (i, 0)),
        compiler_params=pltpu.CompilerParams(
            dimension_semantics=("parallel",),   # megacore / v7x 2-TC sharding
            vmem_limit_bytes=vmem_limit,
        ),
        cost_estimate=cost,
    )(x, w1c, b1r, w2c, b2r)


def reference_forward(x, w1, b1, w2, b2):
    h = jax.nn.sigmoid(x @ w1 + b1)
    return jax.nn.sigmoid(h @ w2 + b2)


if __name__ == "__main__":
    # Small shapes consistent with the module: Linear(input, hidden) -> Linear(hidden, output)
    B, input_size, hidden, output_size = 8, 32, 64, 16

    key = jax.random.PRNGKey(0)
    kx, k1, kb1, k2, kb2 = jax.random.split(key, 5)

    x = jax.random.normal(kx, (B, input_size), dtype=jnp.float32)

    # Deterministic init mimicking nn.Linear's uniform(-1/sqrt(fan_in), 1/sqrt(fan_in)).
    bound1 = 1.0 / (input_size ** 0.5)
    w1 = jax.random.uniform(k1, (input_size, hidden), jnp.float32, -bound1, bound1)
    b1 = jax.random.uniform(kb1, (1, hidden), jnp.float32, -bound1, bound1)

    bound2 = 1.0 / (hidden ** 0.5)
    w2 = jax.random.uniform(k2, (hidden, output_size), jnp.float32, -bound2, bound2)
    b2 = jax.random.uniform(kb2, (1, output_size), jnp.float32, -bound2, bound2)

    # 1) Single small batch, f32 compute path (matches the PyTorch reference).
    out = mlp_forward(x, w1, b1, w2, b2)
    jax.block_until_ready(out)
    ref = reference_forward(x, w1, b1, w2, b2)
    assert out.shape == (B, output_size)
    assert jnp.allclose(out, ref, atol=1e-5, rtol=1e-5)

    # 2) Larger batch that is NOT a tile multiple: exercises the balanced-tile
    #    split (2 tiles of 264 rows) and the ragged last block (no pad / slice).
    B2 = 520
    x2 = jax.random.normal(jax.random.PRNGKey(1), (B2, input_size), dtype=jnp.float32)
    out2 = mlp_forward(x2, w1, b1, w2, b2)
    jax.block_until_ready(out2)
    ref2 = reference_forward(x2, w1, b1, w2, b2)
    assert out2.shape == (B2, output_size)
    assert jnp.allclose(out2, ref2, atol=1e-5, rtol=1e-5)

    # 3) bf16 MXU-input path (f32 accumulate + f32 sigmoid), looser tolerance.
    out3 = mlp_forward(x2, w1, b1, w2, b2, compute_dtype=jnp.bfloat16)
    jax.block_until_ready(out3)
    assert out3.shape == (B2, output_size)
    assert jnp.allclose(out3, ref2, atol=2e-2, rtol=2e-2)

    print("KERNEL_OK")
</pallas_src>

<mosaic_0001>
module attributes {stable_mosaic.version = 11 : i64} {
  func.func @mlp_kernel(%arg0: i32, %arg1: memref<8x32xf32, #tpu.memory_space<vmem>>, %arg2: memref<32x64xf32, #tpu.memory_space<vmem>>, %arg3: memref<1x64xf32, #tpu.memory_space<vmem>>, %arg4: memref<64x16xf32, #tpu.memory_space<vmem>>, %arg5: memref<1x16xf32, #tpu.memory_space<vmem>>, %arg6: memref<8x16xf32, #tpu.memory_space<vmem>>) attributes {dimension_semantics = [#tpu.dimension_semantics<parallel>], iteration_bounds = array<i64: 1>, scalar_prefetch = 0 : i64, scratch_operands = 0 : i64, tpu.core_type = #tpu.core_type<tc>, window_params = [{transform_indices = @transform_0, window_bounds = array<i64: 8, 32>}, {pipeline_mode = #tpu.pipeline_mode<synchronous>, transform_indices = @transform_1, window_bounds = array<i64: 32, 64>}, {pipeline_mode = #tpu.pipeline_mode<synchronous>, transform_indices = @transform_2, window_bounds = array<i64: 1, 64>}, {pipeline_mode = #tpu.pipeline_mode<synchronous>, transform_indices = @transform_3, window_bounds = array<i64: 64, 16>}, {pipeline_mode = #tpu.pipeline_mode<synchronous>, transform_indices = @transform_4, window_bounds = array<i64: 1, 16>}, {transform_indices = @transform_5, window_bounds = array<i64: 8, 16>}]} {
    %c0 = arith.constant 0 : index
    %c0_0 = arith.constant 0 : index
    %0 = vector.load %arg1[%c0, %c0_0] : memref<8x32xf32, #tpu.memory_space<vmem>>, vector<8x32xf32>
    %c0_1 = arith.constant 0 : index
    %c0_2 = arith.constant 0 : index
    %1 = vector.load %arg2[%c0_1, %c0_2] : memref<32x64xf32, #tpu.memory_space<vmem>>, vector<32x64xf32>
    %cst = arith.constant dense<0.000000e+00> : vector<8x64xf32>
    %2 = tpu.matmul %0, %1, %cst {dimension_numbers = #tpu.dot_dimension_numbers<[1], [0], [0], [1], [0, 0, 1, 1], [], []>} : vector<8x32xf32>, vector<32x64xf32>, vector<8x64xf32> -> vector<8x64xf32>
    %c0_3 = arith.constant 0 : index
    %c0_4 = arith.constant 0 : index
    %3 = vector.load %arg3[%c0_3, %c0_4] : memref<1x64xf32, #tpu.memory_space<vmem>>, vector<1x64xf32>
    %4 = vector.broadcast %3 : vector<1x64xf32> to vector<8x64xf32>
    %5 = arith.addf %2, %4 : vector<8x64xf32>
    %cst_5 = arith.constant 0.000000e+00 : f32
    %6 = vector.broadcast %cst_5 : f32 to vector<8x64xf32>
    %7 = arith.subf %6, %5 : vector<8x64xf32>
    %8 = math.exp %7 : vector<8x64xf32>
    %cst_6 = arith.constant 1.000000e+00 : f32
    %9 = vector.broadcast %cst_6 : f32 to vector<8x64xf32>
    %10 = arith.addf %9, %8 : vector<8x64xf32>
    %11 = tpu.reciprocal %10 : vector<8x64xf32> -> vector<8x64xf32>
    %c0_7 = arith.constant 0 : index
    %c0_8 = arith.constant 0 : index
    %12 = vector.load %arg4[%c0_7, %c0_8] : memref<64x16xf32, #tpu.memory_space<vmem>>, vector<64x16xf32>
    %cst_9 = arith.constant dense<0.000000e+00> : vector<8x16xf32>
    %13 = tpu.matmul %11, %12, %cst_9 {dimension_numbers = #tpu.dot_dimension_numbers<[1], [0], [0], [1], [0, 0, 1, 1], [], []>} : vector<8x64xf32>, vector<64x16xf32>, vector<8x16xf32> -> vector<8x16xf32>
    %c0_10 = arith.constant 0 : index
    %c0_11 = arith.constant 0 : index
    %14 = vector.load %arg5[%c0_10, %c0_11] : memref<1x16xf32, #tpu.memory_space<vmem>>, vector<1x16xf32>
    %15 = vector.broadcast %14 : vector<1x16xf32> to vector<8x16xf32>
    %16 = arith.addf %13, %15 : vector<8x16xf32>
    %cst_12 = arith.constant 0.000000e+00 : f32
    %17 = vector.broadcast %cst_12 : f32 to vector<8x16xf32>
    %18 = arith.subf %17, %16 : vector<8x16xf32>
    %19 = math.exp %18 : vector<8x16xf32>
    %cst_13 = arith.constant 1.000000e+00 : f32
    %20 = vector.broadcast %cst_13 : f32 to vector<8x16xf32>
    %21 = arith.addf %20, %19 : vector<8x16xf32>
    %22 = tpu.reciprocal %21 : vector<8x16xf32> -> vector<8x16xf32>
    %c0_14 = arith.constant 0 : index
    %c0_15 = arith.constant 0 : index
    %23 = vector.load %arg6[%c0_14, %c0_15] : memref<8x16xf32, #tpu.memory_space<vmem>>, vector<8x16xf32>
    tpu.vector_store %arg6[%c0_14, %c0_15], %22 {strides = array<i32>} : memref<8x16xf32, #tpu.memory_space<vmem>>, vector<8x16xf32>,
    return
  }
  func.func @transform_0(%arg0: i32) -> (i32, i32) {
    %c0_i32 = arith.constant 0 : i32
    %c0_i32_0 = arith.constant 0 : i32
    return %arg0, %c0_i32 : i32, i32
  }
  func.func @transform_1(%arg0: i32) -> (i32, i32) {
    %c0_i32 = arith.constant 0 : i32
    %c0_i32_0 = arith.constant 0 : i32
    %c0_i32_1 = arith.constant 0 : i32
    return %c0_i32, %c0_i32_0 : i32, i32
  }
  func.func @transform_2(%arg0: i32) -> (i32, i32) {
    %c0_i32 = arith.constant 0 : i32
    %c0_i32_0 = arith.constant 0 : i32
    %c0_i32_1 = arith.constant 0 : i32
    return %c0_i32, %c0_i32_0 : i32, i32
  }
  func.func @transform_3(%arg0: i32) -> (i32, i32) {
    %c0_i32 = arith.constant 0 : i32
    %c0_i32_0 = arith.constant 0 : i32
    %c0_i32_1 = arith.constant 0 : i32
    return %c0_i32, %c0_i32_0 : i32, i32
  }
  func.func @transform_4(%arg0: i32) -> (i32, i32) {
    %c0_i32 = arith.constant 0 : i32
    %c0_i32_0 = arith.constant 0 : i32
    %c0_i32_1 = arith.constant 0 : i32
    return %c0_i32, %c0_i32_0 : i32, i32
  }
  func.func @transform_5(%arg0: i32) -> (i32, i32) {
    %c0_i32 = arith.constant 0 : i32
    %c0_i32_0 = arith.constant 0 : i32
    return %arg0, %c0_i32 : i32, i32
  }
}

</mosaic_0001>

<bundles_post_ra>
// kernel: mlp_forward.1
= control target key start
LH: loop header
LB: loop body
LE: loop exit
PB: predicated region body
PF: predicated region fallthrough
CT: control target
= control target key end

     0   :  { %s262_s0 = inlined_call_operand.vmem [shape: f32[8,32], index: 0, kind: input, shape index: {}]   ;;  %s263_s1 = inlined_call_operand.vmem [shape: f32[32,64], index: 1, kind: input, shape index: {}]   ;;  %s264_s2 = inlined_call_operand.vmem [shape: f32[1,64], index: 2, kind: input, shape index: {}]   ;;  %s265_s3 = inlined_call_operand.vmem [shape: f32[64,16], index: 3, kind: input, shape index: {}]   ;;  %s266_s4 = inlined_call_operand.vmem [shape: f32[1,16], index: 4, kind: input, shape index: {}]   ;;  %s267_s5 = inlined_call_operand.hbm [shape: f32[8,16], index: 5, kind: output, shape index: {}]  }
   0x1   :  { %v25_v0 = vld [vmem:[%s263_s1 + $0x18] sm:$0xff]  ;;  %v24_v1 = vld [vmem:[%s263_s1 + $0x10] sm:$0xff]  ;;  %v23_v2 = vld [vmem:[%s263_s1 + $0x8] sm:$0xff] }
   0x2   :  { %46 = vmatpush.msra.mxu0 %v25_v0 }
   0x3   :  { %10 = vsyncpa [#allocation3], 0  ;;  %v22_v3 = vld [vmem:[%s263_s1] sm:$0xff]  ;;  %vm30_vm0 = vcmask 261120   ;;  %v79_v5 = vld [vmem:[%s265_s3 + $0x38] sm:$0xff]  ;;  %vm84_vm4 = vcmask 523264  }
   0x4   :  { %47 = vmatpush.msra.mxu0 %v24_v1  ;;  %v21_v4 = vld [vmem:[%s262_s0] sm:$0xff]  ;;  %v78_v6 = vld [vmem:[%s265_s3 + $0x30] sm:$0xff]  ;;  %96 = vmatpush.msra.mxu1 %v79_v5  ;;  %v77_v7 = vld [vmem:[%s265_s3 + $0x28] sm:$0xff]  ;;  %s183_s19 = smov [#allocation2]   ;;  %vm126_vm9 = vcmask 130048  }
   0x5   :  { %v76_v8 = vld [vmem:[%s265_s3 + $0x20] sm:$0xff]  ;;  %v75_v9 = vld [vmem:[%s265_s3 + $0x18] sm:$0xff]  ;;  %v74_v10 = vld [vmem:[%s265_s3 + $0x10] sm:$0xff]  ;;  %s133_s20 = sshll.u32 %s183_s19, 4  ;;  %s134_s20 = int_to_ptr.vmem [resolvable:$true] %s133_s20 }
   0x6   :  { %48 = vmatpush.msra.mxu0 %v23_v2  ;;  %97 = vmatpush.msra.mxu1 %v78_v6  ;;  %v73_v11 = vld [vmem:[%s265_s3 + $0x8] sm:$0xff]  ;;  %v72_v12 = vld [vmem:[%s265_s3] sm:$0xff] }
   0x7   :  { %v147_v13 = vld [vmem:[%s264_s2] ss:$0 sm:$0xff] }
   0x8   :  { %49 = vmatpush.msra.mxu0 %v22_v3  ;;  %98 = vmatpush.msra.mxu1 %v77_v7  ;;  %v148_v30 = vld [vmem:[%s266_s4] ss:$0 sm:$0xff]  ;;  %s135_s4 = sshll.u32 %s267_s5, 4  ;;  %s136_s4 = int_to_ptr.hbm [resolvable:$true] %s135_s4 }
   0x9   :  { %144 = vmatmul.msk.f32.vlgmr.msra.gmra.mxu0 %vm30_vm0, %v21_v4 }
   0xa   :  { %99 = vmatpush.msra.mxu1 %v76_v8 }
   0xc   :  { %100 = vmatpush.msra.mxu1 %v75_v9 }
   0xe   :  { %101 = vmatpush.msra.mxu1 %v74_v10 }
  0x10   :  { %102 = vmatpush.msra.mxu1 %v73_v11 }
  0x12   :  { %103 = vmatpush.msra.mxu1 %v72_v12 }
  0x86   :  { %v51_v14 = vpop.f32.mrf.mxu0 }
  0x87   :  { %v52_v15 = vadd.f32 %v147_v13, %v51_v14 }
  0x89   :  { %v54_v16 = vsub.f32 0.0, %v52_v15 }
  0x8b   :  { %v55_v17 = vmul.f32 1.442695, %v54_v16 }
  0x8d   :  { %149 = vpow2.f32 %v55_v17 }
  0x93   :  { %v150_v18 = vpop.eup %149 }
  0x94   :  { %v57_v19 = vadd.f32 1.0, %v150_v18 }
  0x96   :  { %151 = vrcp.f32 %v57_v19  ;;  %v69_v23 = vand.u32 2147483648, %v57_v19  ;;  %v67_v25 = vand.u32 2147483647, %v57_v19  ;;  %vm63_vm2 = vweird.f32 %v57_v19 }
  0x98   :  { %v70_v27 = vor.u32 1.1754944e-38, %v69_v23  ;;  %vm68_vm5 = vcmp.eq.f32.partialorder %v67_v25, 8.507059e+37 }
  0x9c   :  { %v152_v20 = vpop.eup %151 }
  0x9d   :  { %v59_v21 = vmul.f32 %v152_v20, %v57_v19  ;;  %vm64_vm1 = vweird.f32 %v152_v20 }
  0x9e   :  { %vm65_vm3 = vmor %vm63_vm2, %vm64_vm1 }
  0x9f   :  { %v60_v22 = vsub.f32 1.0, %v59_v21 }
  0xa1   :  { %v61_v24 = vmul.f32 %v152_v20, %v60_v22 }
  0xa3   :  { %v62_v26 = vadd.f32 %v152_v20, %v61_v24 }
  0xa5   :  { %v66_v28 = vsel %vm65_vm3, %v152_v20, %v62_v26 }
  0xa6   :  { %v71_v29 = vsel %vm68_vm5, %v70_v27, %v66_v28 }
  0xa7   :  { %145 = vmatmul.msk.f32.vlgmr.msra.gmra.mxu1 %vm84_vm4, %v71_v29 }
 0x124   :  { %v105_v31 = vpop.f32.mrf.mxu1 }
 0x125   :  { %v106_v32 = vadd.f32 %v148_v30, %v105_v31 }
 0x127   :  { %v108_v33 = vsub.f32 0.0, %v106_v32 }
 0x129   :  { %v109_v34 = vmul.f32 1.442695, %v108_v33 }
 0x12b   :  { %153 = vpow2.f32 %v109_v34 }
 0x131   :  { %v154_v35 = vpop.eup %153 }
 0x132   :  { %v111_v36 = vadd.f32 1.0, %v154_v35 }
 0x134   :  { %155 = vrcp.f32 %v111_v36  ;;  %v123_v40 = vand.u32 2147483648, %v111_v36  ;;  %v121_v42 = vand.u32 2147483647, %v111_v36  ;;  %vm117_vm7 = vweird.f32 %v111_v36 }
 0x136   :  { %v124_v44 = vor.u32 1.1754944e-38, %v123_v40  ;;  %vm122_vm10 = vcmp.eq.f32.partialorder %v121_v42, 8.507059e+37 }
 0x13a   :  { %v156_v37 = vpop.eup %155 }
 0x13b   :  { %v113_v38 = vmul.f32 %v156_v37, %v111_v36  ;;  %vm118_vm6 = vweird.f32 %v156_v37 }
 0x13c   :  { %vm119_vm8 = vmor %vm117_vm7, %vm118_vm6 }
 0x13d   :  { %v114_v39 = vsub.f32 1.0, %v113_v38 }
 0x13f   :  { %v115_v41 = vmul.f32 %v156_v37, %v114_v39 }
 0x141   :  { %v116_v43 = vadd.f32 %v156_v37, %v115_v41 }
 0x143   :  { %v120_v45 = vsel %vm119_vm8, %v156_v37, %v116_v43 }
 0x144   :  { %v125_v46 = vsel %vm122_vm10, %v124_v44, %v120_v45 }
 0x145   :  { %127 = vst.msk [vmem:[#allocation2] sm:$0xff] %vm126_vm9, %v125_v46 }
 0x146   :  { %138 = dma.vmem_to_hbm [thread:$0]  %s134_s20, 128, %s136_s4, [#allocation3]  }
 0x147   :  { %181 = dma.done.wait [#allocation3], 128  }
 0x148   :  { %182 = vsyncadd [#allocation3], 4294967168 }
 0x149   :  { %143 = vsyncpa [#allocation3], 1 }

</bundles_post_ra>
